<compile_context>
chip_gen: v7x
topology: tpu7x:2x2x1
jax: 0.10.0
libtpu: 0.0.40
codegen_flags: <defaults>
</compile_context>

<pallas_src>
import jax
import jax.numpy as jnp
from jax.experimental import pallas as pl
from jax.experimental.pallas import tpu as pltpu

raw_text = ('We are about to study the idea of a computational process.\n'
            'Computational processes are abstract beings that inhabit computers.\n'
            'As they evolve, processes manipulate other abstract things called data.\n'
            'The evolution of a process is directed by a pattern of rules\n'
            'called a program. People create programs to direct processes. In effect,\n'
            'we conjure the spirits of the computer with our spells.').split()

vocab = sorted(set(raw_text))          # sorted -> deterministic word ordering
VOCAB_SIZE = len(vocab)                # matches the PyTorch module's vocab_size
EMBEDDING_DIM = 16
CONTEXT_SIZE = 4                       # e.g. 2 words left + 2 words right
HIDDEN = 128
IN_FEAT = CONTEXT_SIZE * EMBEDDING_DIM           # 64
VOCAB_PAD = 128 * pl.cdiv(VOCAB_SIZE, 128)       # lane-dense padded vocab (128)
TILE_B = 128                                     # batch tile (MXU-friendly M)
NEG_BIG = -1e30                                  # mask value for padded logits


def cbow_kernel(x_ref, w1_ref, b1_ref, w2_ref, b2_ref, o_ref):
    # x_ref : (TILE_B, IN_FEAT)    bf16 flattened context embeddings
    # w1_ref: (IN_FEAT, HIDDEN)    bf16,  b1_ref: (1, HIDDEN)    f32
    # w2_ref: (HIDDEN, VOCAB_PAD)  bf16,  b2_ref: (1, VOCAB_PAD) f32 (padded cols = -1e30)
    # o_ref : (TILE_B, VOCAB_PAD)  f32 log-probabilities (padded cols garbage, sliced off outside)

    # linear1 + ReLU (bf16 MXU matmul, f32 accumulate)
    h = jnp.dot(x_ref[...], w1_ref[...], preferred_element_type=jnp.float32)
    h = jnp.maximum(h + b1_ref[...], 0.0)

    # linear2 (padded bias = -1e30 masks padded vocab columns out of the softmax)
    logits = jnp.dot(h.astype(w2_ref.dtype), w2_ref[...],
                     preferred_element_type=jnp.float32) + b2_ref[...]

    # log_softmax along dim=1 (numerically stable, f32 exp/log on the EUP)
    m = jnp.max(logits, axis=-1, keepdims=True)
    shifted = logits - m
    lse = jnp.log(jnp.sum(jnp.exp(shifted), axis=-1, keepdims=True))
    o_ref[...] = shifted - lse


@jax.jit
def cbow_forward(inputs, embedding, w1, b1, w2, b2):
    """inputs: (B, CONTEXT_SIZE) int32 word indices. Returns (B, VOCAB_SIZE) f32 log-probs."""
    B = inputs.shape[0]

    # Embedding lookup + .view(B, -1) flatten — tiny gather, done as JAX glue.
    x = embedding[inputs].reshape(B, IN_FEAT).astype(jnp.bfloat16)

    # Pad batch to a multiple of TILE_B (so B=1 inference still works).
    B_pad = TILE_B * pl.cdiv(B, TILE_B)
    if B_pad != B:
        x = jnp.pad(x, ((0, B_pad - B), (0, 0)))

    # Lane-pad the vocab dimension to 128; padded logits get bias -1e30.
    w1b = w1.astype(jnp.bfloat16)
    w2p = jnp.zeros((HIDDEN, VOCAB_PAD), jnp.bfloat16).at[:, :VOCAB_SIZE].set(
        w2.astype(jnp.bfloat16))
    b2p = jnp.full((1, VOCAB_PAD), NEG_BIG, jnp.float32).at[:, :VOCAB_SIZE].set(b1
        if False else b2)  # keep b2; (no-op guard to avoid accidental shadowing)

    grid = (B_pad // TILE_B,)
    out = pl.pallas_call(
        cbow_kernel,
        out_shape=jax.ShapeDtypeStruct((B_pad, VOCAB_PAD), jnp.float32),
        grid_spec=pltpu.PrefetchScalarGridSpec(
            num_scalar_prefetch=0,
            grid=grid,
            in_specs=[
                pl.BlockSpec((TILE_B, IN_FEAT), lambda i: (i, 0)),     # x: tiled over batch
                pl.BlockSpec((IN_FEAT, HIDDEN), lambda i: (0, 0)),     # w1: resident
                pl.BlockSpec((1, HIDDEN), lambda i: (0, 0)),           # b1: resident
                pl.BlockSpec((HIDDEN, VOCAB_PAD), lambda i: (0, 0)),   # w2: resident
                pl.BlockSpec((1, VOCAB_PAD), lambda i: (0, 0)),        # b2: resident
            ],
            out_specs=pl.BlockSpec((TILE_B, VOCAB_PAD), lambda i: (i, 0)),
        ),
        compiler_params=pltpu.CompilerParams(
            dimension_semantics=("parallel",)),                        # 2 TCs on v7x
    )(x, w1b, b1, w2p, b2p)

    # Strip batch padding and padded vocab lanes.
    return out[:B, :VOCAB_SIZE]


def init_params(key):
    k_emb, k_w1, k_b1, k_w2, k_b2 = jax.random.split(key, 5)
    embedding = jax.random.normal(k_emb, (VOCAB_SIZE, EMBEDDING_DIM), jnp.float32)
    # Uniform(-1/sqrt(fan_in), 1/sqrt(fan_in)) like nn.Linear defaults (deterministic).
    lim1 = 1.0 / jnp.sqrt(IN_FEAT)
    lim2 = 1.0 / jnp.sqrt(HIDDEN)
    w1 = jax.random.uniform(k_w1, (IN_FEAT, HIDDEN), jnp.float32, -lim1, lim1)
    b1 = jax.random.uniform(k_b1, (1, HIDDEN), jnp.float32, -lim1, lim1)
    w2 = jax.random.uniform(k_w2, (HIDDEN, VOCAB_SIZE), jnp.float32, -lim2, lim2)
    b2 = jax.random.uniform(k_b2, (1, VOCAB_SIZE), jnp.float32, -lim2, lim2)
    return embedding, w1, b1, w2, b2


if __name__ == "__main__":
    key = jax.random.PRNGKey(0)
    k_params, k_idx = jax.random.split(key)
    embedding, w1, b1, w2, b2 = init_params(k_params)

    # Batched deterministic context word indices: (B, CONTEXT_SIZE)
    B = 256
    inputs = jax.random.randint(k_idx, (B, CONTEXT_SIZE), 0, VOCAB_SIZE, jnp.int32)

    log_probs = cbow_forward(inputs, embedding, w1, b1, w2, b2)
    jax.block_until_ready(log_probs)

    # sanity: each row's log_softmax output must (approximately) sum to 1 after exp
    assert log_probs.shape == (B, VOCAB_SIZE)
    assert jnp.allclose(jnp.exp(log_probs).sum(axis=1), 1.0, atol=1e-3)

    # cross-check against pure-JAX reference using the same bf16-rounded weights
    xf = embedding[inputs].reshape(B, IN_FEAT).astype(jnp.bfloat16).astype(jnp.float32)
    w1f = w1.astype(jnp.bfloat16).astype(jnp.float32)
    w2f = w2.astype(jnp.bfloat16).astype(jnp.float32)
    ref_h = jnp.maximum(xf @ w1f + b1, 0.0)
    ref_logits = ref_h.astype(jnp.bfloat16).astype(jnp.float32) @ w2f + b2
    ref = jax.nn.log_softmax(ref_logits, axis=1)
    assert jnp.allclose(log_probs, ref, atol=5e-3), float(jnp.abs(log_probs - ref).max())

    print("KERNEL_OK")
</pallas_src>

<mosaic_0001>
module attributes {stable_mosaic.version = 11 : i64} {
  func.func @cbow_kernel(%arg0: i32, %arg1: memref<128x64xbf16, #tpu.memory_space<vmem>>, %arg2: memref<64x128xbf16, #tpu.memory_space<vmem>>, %arg3: memref<1x128xf32, #tpu.memory_space<vmem>>, %arg4: memref<128x128xbf16, #tpu.memory_space<vmem>>, %arg5: memref<1x128xf32, #tpu.memory_space<vmem>>, %arg6: memref<128x128xf32, #tpu.memory_space<vmem>>) attributes {dimension_semantics = [#tpu.dimension_semantics<parallel>], iteration_bounds = array<i64: 2>, scalar_prefetch = 0 : i64, scratch_operands = 0 : i64, tpu.core_type = #tpu.core_type<tc>, window_params = [{transform_indices = @transform_0, window_bounds = array<i64: 128, 64>}, {pipeline_mode = #tpu.pipeline_mode<synchronous>, transform_indices = @transform_1, window_bounds = array<i64: 64, 128>}, {pipeline_mode = #tpu.pipeline_mode<synchronous>, transform_indices = @transform_2, window_bounds = array<i64: 1, 128>}, {pipeline_mode = #tpu.pipeline_mode<synchronous>, transform_indices = @transform_3, window_bounds = array<i64: 128, 128>}, {pipeline_mode = #tpu.pipeline_mode<synchronous>, transform_indices = @transform_4, window_bounds = array<i64: 1, 128>}, {transform_indices = @transform_5, window_bounds = array<i64: 128, 128>}]} {
    %c0 = arith.constant 0 : index
    %c0_0 = arith.constant 0 : index
    %0 = vector.load %arg1[%c0, %c0_0] : memref<128x64xbf16, #tpu.memory_space<vmem>>, vector<128x64xbf16>
    %c0_1 = arith.constant 0 : index
    %c0_2 = arith.constant 0 : index
    %1 = vector.load %arg2[%c0_1, %c0_2] : memref<64x128xbf16, #tpu.memory_space<vmem>>, vector<64x128xbf16>
    %cst = arith.constant dense<0.000000e+00> : vector<128x128xf32>
    %2 = tpu.matmul %0, %1, %cst {dimension_numbers = #tpu.dot_dimension_numbers<[1], [0], [0], [1], [0, 0, 1, 1], [], []>} : vector<128x64xbf16>, vector<64x128xbf16>, vector<128x128xf32> -> vector<128x128xf32>
    %c0_3 = arith.constant 0 : index
    %c0_4 = arith.constant 0 : index
    %3 = vector.load %arg3[%c0_3, %c0_4] : memref<1x128xf32, #tpu.memory_space<vmem>>, vector<1x128xf32>
    %4 = vector.broadcast %3 : vector<1x128xf32> to vector<128x128xf32>
    %5 = arith.addf %2, %4 : vector<128x128xf32>
    %cst_5 = arith.constant 0.000000e+00 : f32
    %6 = vector.broadcast %cst_5 : f32 to vector<128x128xf32>
    %7 = arith.maximumf %5, %6 : vector<128x128xf32>
    %8 = arith.truncf %7 : vector<128x128xf32> to vector<128x128xbf16>
    %c0_6 = arith.constant 0 : index
    %c0_7 = arith.constant 0 : index
    %9 = vector.load %arg4[%c0_6, %c0_7] : memref<128x128xbf16, #tpu.memory_space<vmem>>, vector<128x128xbf16>
    %cst_8 = arith.constant dense<0.000000e+00> : vector<128x128xf32>
    %10 = tpu.matmul %8, %9, %cst_8 {dimension_numbers = #tpu.dot_dimension_numbers<[1], [0], [0], [1], [0, 0, 1, 1], [], []>} : vector<128x128xbf16>, vector<128x128xbf16>, vector<128x128xf32> -> vector<128x128xf32>
    %c0_9 = arith.constant 0 : index
    %c0_10 = arith.constant 0 : index
    %11 = vector.load %arg5[%c0_9, %c0_10] : memref<1x128xf32, #tpu.memory_space<vmem>>, vector<1x128xf32>
    %12 = vector.broadcast %11 : vector<1x128xf32> to vector<128x128xf32>
    %13 = arith.addf %10, %12 : vector<128x128xf32>
    %cst_11 = arith.constant dense<0xFF800000> : vector<128xf32>
    %14 = vector.multi_reduction <maximumf>, %13, %cst_11 [1] : vector<128x128xf32> to vector<128xf32>
    %15 = vector.shape_cast %14 : vector<128xf32> to vector<128x1xf32>
    %16 = vector.broadcast %15 : vector<128x1xf32> to vector<128x128xf32>
    %17 = arith.subf %13, %16 : vector<128x128xf32>
    %18 = math.exp %17 : vector<128x128xf32>
    %cst_12 = arith.constant dense<0.000000e+00> : vector<128xf32>
    %19 = vector.multi_reduction <add>, %18, %cst_12 [1] : vector<128x128xf32> to vector<128xf32>
    %20 = vector.shape_cast %19 : vector<128xf32> to vector<128x1xf32>
    %21 = math.log %20 : vector<128x1xf32>
    %22 = vector.broadcast %21 : vector<128x1xf32> to vector<128x128xf32>
    %23 = arith.subf %17, %22 : vector<128x128xf32>
    %c0_13 = arith.constant 0 : index
    %c0_14 = arith.constant 0 : index
    %24 = vector.load %arg6[%c0_13, %c0_14] : memref<128x128xf32, #tpu.memory_space<vmem>>, vector<128x128xf32>
    tpu.vector_store %arg6[%c0_13, %c0_14], %23 {strides = array<i32>} : memref<128x128xf32, #tpu.memory_space<vmem>>, vector<128x128xf32>,
    return
  }
  func.func @transform_0(%arg0: i32) -> (i32, i32) {
    %c0_i32 = arith.constant 0 : i32
    %c0_i32_0 = arith.constant 0 : i32
    return %arg0, %c0_i32 : i32, i32
  }
  func.func @transform_1(%arg0: i32) -> (i32, i32) {
    %c0_i32 = arith.constant 0 : i32
    %c0_i32_0 = arith.constant 0 : i32
    %c0_i32_1 = arith.constant 0 : i32
    return %c0_i32, %c0_i32_0 : i32, i32
  }
  func.func @transform_2(%arg0: i32) -> (i32, i32) {
    %c0_i32 = arith.constant 0 : i32
    %c0_i32_0 = arith.constant 0 : i32
    %c0_i32_1 = arith.constant 0 : i32
    return %c0_i32, %c0_i32_0 : i32, i32
  }
  func.func @transform_3(%arg0: i32) -> (i32, i32) {
    %c0_i32 = arith.constant 0 : i32
    %c0_i32_0 = arith.constant 0 : i32
    %c0_i32_1 = arith.constant 0 : i32
    return %c0_i32, %c0_i32_0 : i32, i32
  }
  func.func @transform_4(%arg0: i32) -> (i32, i32) {
    %c0_i32 = arith.constant 0 : i32
    %c0_i32_0 = arith.constant 0 : i32
    %c0_i32_1 = arith.constant 0 : i32
    return %c0_i32, %c0_i32_0 : i32, i32
  }
  func.func @transform_5(%arg0: i32) -> (i32, i32) {
    %c0_i32 = arith.constant 0 : i32
    %c0_i32_0 = arith.constant 0 : i32
    return %arg0, %c0_i32 : i32, i32
  }
}

</mosaic_0001>

<bundles_post_ra>
// kernel: cbow_forward.1
= control target key start
LH: loop header
LB: loop body
LE: loop exit
PB: predicated region body
PF: predicated region fallthrough
CT: control target
= control target key end

     0   :  { %s1141_s18 = smov 0   ;;  %s1324_s0 = inlined_call_operand.vmem [shape: bf16[256,64], index: 0, kind: input, shape index: {}]   ;;  %s1325_s1 = inlined_call_operand.vmem [shape: bf16[64,128], index: 1, kind: input, shape index: {}]   ;;  %s1326_s2 = inlined_call_operand.vmem [shape: f32[1,128], index: 2, kind: input, shape index: {}]   ;;  %s1327_s3 = inlined_call_operand.vmem [shape: bf16[128,128], index: 3, kind: input, shape index: {}]   ;;  %s1328_s4 = inlined_call_operand.vmem [shape: f32[1,128], index: 4, kind: input, shape index: {}]   ;;  %s1329_s5 = inlined_call_operand.vmem [shape: f32[256,128], index: 5, kind: output, shape index: {}]  }
   0x1 LB: > { %s870_s19 = sadd.s32 4294967295, %s1109_s18   ;;  %p874_p0 = scmp.ge.s32.totalorder %s1109_s18, 1  ;;  %s1109_s18 = sphi %s1141_s18, %s15_s18  }
   0x2   : > { %p188_p1 = scmp.lt.s32.totalorder %s1109_s18, 3 }
   0x4   : > { %p189_p2 = pnand %p874_p0, %p188_p1 }
   0x5   : > { %v1019_v0 = vld [vmem:[%s1325_s1] sm:$0xff] (!%p189_p2)   ;;  %s875_s22 = sshll.u32 (!%p189_p2), %s870_s19, 4  ;;  %v1020_v1 = vld [vmem:[%s1325_s1 + $0x8] sm:$0xff] (!%p189_p2)   ;;  %v1021_v2 = vld [vmem:[%s1325_s1 + $0x10] sm:$0xff] (!%p189_p2)   ;;  %vm324_vm0 = vcmask (!%p189_p2), 523264  }
   0x6   : > { %192 = sbr.rel (%p189_p2) target bundleno = 805 (0x325), region = 40  ;;  %p217_p3 = scmp.lt.s32.totalorder (!%p189_p2), %s875_s22, 31  ;;  %939 = vmatprep.subr.bf16.mxu0 (!%p189_p2), %v1019_v0  ;;  %v1031_v3 = vld [vmem:[%s1327_s3] sm:$0xff] (!%p189_p2)   ;;  %v1032_v4 = vld [vmem:[%s1327_s3 + $0x8] sm:$0xff] (!%p189_p2)   ;;  %v1022_v6 = vld [vmem:[%s1325_s1 + $0x18] sm:$0xff] (!%p189_p2)  }
   0x7   : > { %940 = vmatpush3.bf16.msra.mxu0 (!%p189_p2), %v1019_v0  ;;  %995 = vmatprep.subr.bf16.mxu1 (!%p189_p2), %v1031_v3  ;;  %v1033_v9 = vld [vmem:[%s1327_s3 + $0x10] sm:$0xff] (!%p189_p2)   ;;  %v1034_v10 = vld [vmem:[%s1327_s3 + $0x18] sm:$0xff] (!%p189_p2)   ;;  %v1035_v11 = vld [vmem:[%s1327_s3 + $0x20] sm:$0xff] (!%p189_p2)  }
   0x8   : > { %941 = vmatprep.subr.bf16.mxu0 (!%p189_p2), %v1020_v1  ;;  %1003 = vmatpush3.bf16.msra.mxu1 (!%p189_p2), %v1031_v3  ;;  %v1036_v14 = vld [vmem:[%s1327_s3 + $0x28] sm:$0xff] (!%p189_p2)   ;;  %v1037_v18 = vld [vmem:[%s1327_s3 + $0x30] sm:$0xff] (!%p189_p2)   ;;  %v1038_v19 = vld [vmem:[%s1327_s3 + $0x38] sm:$0xff] (!%p189_p2)  }
   0x9   : > { %996 = vmatprep.subr.bf16.mxu1 (!%p189_p2), %v1032_v4  ;;  %v879_v20 = vld [vmem:[%s1326_s2] ss:$0 sm:$0xff] (!%p189_p2) }
   0xb   : > { %942 = vmatpush3.bf16.msra.mxu0 (!%p189_p2), %v1020_v1 }
   0xc   : > { %943 = vmatprep.subr.bf16.mxu0 (!%p189_p2), %v1021_v2  ;;  %1004 = vmatpush3.bf16.msra.mxu1 (!%p189_p2), %v1032_v4 }
   0xd   : > { %s1331_s22 = smov (!%p217_p3, %s875_s22), 31  ;;  %997 = vmatprep.subr.bf16.mxu1 %v1033_v9 }
   0xe   : > { %s876_s29 = sshll.u32 %s1331_s22, 2  ;;  %s878_s30 = sshll.u32 %s1331_s22, 3 }
   0xf   : > { %s1167_s7 = scalar_lea.vmem %s1324_s0, %s876_s29  ;;  %944 = vmatpush3.bf16.msra.mxu0 %v1021_v2  ;;  %s1287_s8 = scalar_lea.vmem %s1329_s5, %s878_s30 }
  0x10   : > { %v1023_v5 = vld [vmem:[%s1167_s7] sm:$0xff]   ;;  %945 = vmatprep.subr.bf16.mxu0 %v1022_v6  ;;  %v1024_v7 = vld [vmem:[%s1167_s7 + $0x8] sm:$0xff]   ;;  %v1025_v8 = vld [vmem:[%s1167_s7 + $0x10] sm:$0xff]   ;;  %1005 = vmatpush3.bf16.msra.mxu1 %v1033_v9 }
  0x11   : > { %947 = vmatprep.mubr.msk.bf16.mxu0 %vm324_vm0, %v1023_v5  ;;  %998 = vmatprep.subr.bf16.mxu1 %v1034_v10  ;;  %v1026_v12 = vld [vmem:[%s1167_s7 + $0x18] sm:$0xff]   ;;  %v1027_v13 = vld [vmem:[%s1167_s7 + $0x20] sm:$0xff]   ;;  %v1028_v15 = vld [vmem:[%s1167_s7 + $0x28] sm:$0xff]  }
  0x12   : > { %v1029_v16 = vld [vmem:[%s1167_s7 + $0x30] sm:$0xff]   ;;  %v1030_v17 = vld [vmem:[%s1167_s7 + $0x38] sm:$0xff]  }
  0x13   : > { %946 = vmatpush3.bf16.msra.mxu0 %v1022_v6 }
  0x14   : > { %963 = vmatprep.subr.bf16.mxu0 %v1031_v3  ;;  %1006 = vmatpush3.bf16.msra.mxu1 %v1034_v10 }
  0x15   : > { %999 = vmatprep.subr.bf16.mxu1 %v1035_v11 }
  0x16   : > { %948 = vmatmul.mubr.msk.bf16.vlgmr.msra.gmra.mrb[0].mxu0 %vm324_vm0, %v1024_v7 }
  0x17   : > { %951 = vmatprep.mubr.msk.bf16.mxu0 %vm324_vm0, %v1025_v8  ;;  %964 = vmatpush3.bf16.msra.mxu0 %v1031_v3 }
  0x18   : > { %965 = vmatprep.subr.bf16.mxu0 %v1032_v4  ;;  %1007 = vmatpush3.bf16.msra.mxu1 %v1035_v11 }
  0x19   : > { %1000 = vmatprep.subr.bf16.mxu1 %v1036_v14 }
  0x1b   : > { %966 = vmatpush3.bf16.msra.mxu0 %v1032_v4 }
  0x1c   : > { %967 = vmatprep.subr.bf16.mxu0 %v1033_v9  ;;  %1008 = vmatpush3.bf16.msra.mxu1 %v1036_v14 }
  0x1d   : > { %1001 = vmatprep.subr.bf16.mxu1 %v1037_v18 }
  0x1e   : > { %952 = vmatmul.mubr.msk.bf16.gmra.mrb[4].mxu0 %vm324_vm0, %v1026_v12 }
  0x1f   : > { %955 = vmatprep.mubr.msk.bf16.mxu0 %vm324_vm0, %v1027_v13  ;;  %968 = vmatpush3.bf16.msra.mxu0 %v1033_v9  ;;  %v900_v13 = vld [vmem:[%s1328_s4] ss:$0 sm:$0xff] }
  0x20   : > { %969 = vmatprep.subr.bf16.mxu0 %v1034_v10  ;;  %1009 = vmatpush3.bf16.msra.mxu1 %v1037_v18 }
  0x21   : > { %1002 = vmatprep.subr.bf16.mxu1 %v1038_v19 }
  0x23   : > { %970 = vmatpush3.bf16.msra.mxu0 %v1034_v10 }
  0x24   : > { %971 = vmatprep.subr.bf16.mxu0 %v1035_v11  ;;  %1010 = vmatpush3.bf16.msra.mxu1 %v1038_v19 }
  0x26   : > { %956 = vmatmul.mubr.msk.bf16.gmra.mrb[8].mxu0 %vm324_vm0, %v1028_v15 }
  0x27   : > { %959 = vmatprep.mubr.msk.bf16.mxu0 %vm324_vm0, %v1029_v16  ;;  %972 = vmatpush3.bf16.msra.mxu0 %v1035_v11 }
  0x28   : > { %973 = vmatprep.subr.bf16.mxu0 %v1036_v14 }
  0x2b   : > { %974 = vmatpush3.bf16.msra.mxu0 %v1036_v14 }
  0x2c   : > { %975 = vmatprep.subr.bf16.mxu0 %v1037_v18 }
  0x2e   : > { %960 = vmatmul.mubr.msk.bf16.gmra.mrb[12].mxu0 %vm324_vm0, %v1030_v17 }
  0x2f   : > { %976 = vmatpush3.bf16.msra.mxu0 %v1037_v18 }
  0x30   : > { %977 = vmatprep.subr.bf16.mxu0 %v1038_v19 }
  0x33   : > { %978 = vmatpush3.bf16.msra.mxu0 %v1038_v19 }
  0xe9   : > { %v949_v21 = vpop.f32.mrb[0].mxu0 }
  0xea   : > { %v392_v22 = vadd.f32 %v949_v21, %v879_v20  ;;  %v383_v23 = vpop.f32.mrb[1].mxu0 }
  0xeb   : > { %v384_v24 = vadd.f32 %v879_v20, %v383_v23  ;;  %v950_v25 = vpop.f32.mrb[2].mxu0 }
  0xec   : > { %v395_v26 = vadd.f32 %v950_v25, %v879_v20  ;;  %v386_v27 = vpop.f32.mrb[3].mxu0  ;;  %v448_v29 = vmax.f32 %v392_v22, 0.0 }
  0xed   : > { %v387_v28 = vadd.f32 %v879_v20, %v386_v27  ;;  %v446_v31 = vmax.f32 %v384_v24, 0.0 }
  0xee   : > { %v449_v30 = vmax.f32 %v395_v26, 0.0 }
  0xef   : > { %v447_v32 = vmax.f32 %v387_v28, 0.0 }
  0xf0   : > { %v463_v33 = vpack.c.bf16 %v449_v30, %v448_v29 }
  0xf1   : > { %v462_v34 = vpack.c.bf16 %v447_v32, %v446_v31  ;;  %v953_v35 = vpop.f32.mrb[4].mxu0 }
  0xf2   : > { %v408_v36 = vadd.f32 %v953_v35, %v879_v20  ;;  %v399_v37 = vpop.f32.mrb[5].mxu0 }
  0xf3   : > { %v400_v38 = vadd.f32 %v879_v20, %v399_v37  ;;  %v954_v39 = vpop.f32.mrb[6].mxu0  ;;  %979 = vmatprep.mubr.bf16.mxu0 %v462_v34 }
  0xf4   : > { %v452_v40 = vmax.f32 %v408_v36, 0.0  ;;  %v411_v41 = vadd.f32 %v954_v39, %v879_v20  ;;  %v402_v42 = vpop.f32.mrb[7].mxu0  ;;  %980 = vmatmul.mubr.bf16.vlgmr.msra.gmra.mrb[16].mxu0 %v463_v33 }
  0xf5   : > { %v403_v43 = vadd.f32 %v879_v20, %v402_v42  ;;  %v450_v45 = vmax.f32 %v400_v38, 0.0 }
  0xf6   : > { %v453_v44 = vmax.f32 %v411_v41, 0.0 }
  0xf7   : > { %v451_v46 = vmax.f32 %v403_v43, 0.0 }
  0xf8   : > { %v465_v47 = vpack.c.bf16 %v453_v44, %v452_v40 }
  0xf9   : > { %v957_v48 = vpop.f32.mrb[8].mxu0  ;;  %v464_v49 = vpack.c.bf16 %v451_v46, %v450_v45 }
  0xfa   : > { %v424_v50 = vadd.f32 %v957_v48, %v879_v20  ;;  %v415_v51 = vpop.f32.mrb[9].mxu0 }
  0xfb   : > { %v416_v52 = vadd.f32 %v879_v20, %v415_v51  ;;  %v958_v53 = vpop.f32.mrb[10].mxu0  ;;  %983 = vmatprep.mubr.bf16.mxu1 %v464_v49 }
  0xfc   : > { %v456_v54 = vmax.f32 %v424_v50, 0.0  ;;  %v427_v55 = vadd.f32 %v958_v53, %v879_v20  ;;  %v418_v56 = vpop.f32.mrb[11].mxu0  ;;  %984 = vmatmul.mubr.bf16.vlgmr.msra.gmra.mrb[0].mxu1 %v465_v47 }
  0xfd   : > { %v419_v57 = vadd.f32 %v879_v20, %v418_v56  ;;  %v454_v59 = vmax.f32 %v416_v52, 0.0 }
  0xfe   : > { %v457_v58 = vmax.f32 %v427_v55, 0.0 }
  0xff   : > { %v455_v60 = vmax.f32 %v419_v57, 0.0 }
 0x100   : > { %v467_v61 = vpack.c.bf16 %v457_v58, %v456_v54 }
 0x101   : > { %v466_v62 = vpack.c.bf16 %v455_v60, %v454_v59  ;;  %v961_v63 = vpop.f32.mrb[12].mxu0 }
 0x102   : > { %v440_v0 = vadd.f32 %v961_v63, %v879_v20  ;;  %v431_v1 = vpop.f32.mrb[13].mxu0 }
 0x103   : > { %v432_v2 = vadd.f32 %v879_v20, %v431_v1  ;;  %v962_v3 = vpop.f32.mrb[14].mxu0  ;;  %987 = vmatprep.mubr.bf16.mxu1 %v466_v62 }
 0x104   : > { %v460_v4 = vmax.f32 %v440_v0, 0.0  ;;  %v443_v5 = vadd.f32 %v962_v3, %v879_v20  ;;  %v434_v6 = vpop.f32.mrb[15].mxu0  ;;  %988 = vmatmul.mubr.bf16.gmra.mrb[4].mxu1 %v467_v61 }
 0x105   : > { %v435_v7 = vadd.f32 %v879_v20, %v434_v6  ;;  %v458_v9 = vmax.f32 %v432_v2, 0.0 }
 0x106   : > { %v461_v8 = vmax.f32 %v443_v5, 0.0 }
 0x107   : > { %v459_v10 = vmax.f32 %v435_v7, 0.0 }
 0x108   : > { %v469_v11 = vpack.c.bf16 %v461_v8, %v460_v4 }
 0x109   : > { %v468_v12 = vpack.c.bf16 %v459_v10, %v458_v9 }
 0x10b   : > { %991 = vmatprep.mubr.bf16.mxu1 %v468_v12 }
 0x10c   : > { %992 = vmatmul.mubr.bf16.gmra.mrb[8].mxu1 %v469_v11 }
 0x1c7   : > { %v981_v14 = vpop.f32.mrb[16].mxu0 }
 0x1c8   : > { %v584_v15 = vadd.f32 %v981_v14, %v900_v13  ;;  %v575_v16 = vpop.f32.mrb[17].mxu0 }
 0x1c9   : > { %v576_v17 = vadd.f32 %v900_v13, %v575_v16  ;;  %v982_v18 = vpop.f32.mrb[18].mxu0 }
 0x1ca   : > { %642 = vmax.xlane.f32.xlu1 %v584_v15  ;;  %v578_v19 = vpop.f32.mrb[19].mxu0  ;;  %v587_v20 = vadd.f32 %v982_v18, %v900_v13 }
 0x1cb   : > { %638 = vmax.xlane.f32.xlu0 %v576_v17  ;;  %v579_v21 = vadd.f32 %v900_v13, %v578_v19 }
 0x1ce   : > { %644 = vmax.xlane.f32.xlu1 %v587_v20 }
 0x1cf   : > { %v985_v22 = vpop.f32.mrb[0].mxu1  ;;  %640 = vmax.xlane.f32.xlu0 %v579_v21 }
 0x1d0   : > { %v600_v23 = vadd.f32 %v985_v22, %v900_v13  ;;  %v591_v24 = vpop.f32.mrb[1].mxu1 }
 0x1d1   : > { %v986_v25 = vpop.f32.mrb[2].mxu1  ;;  %v592_v28 = vadd.f32 %v900_v13, %v591_v24 }
 0x1d2   : > { %v603_v26 = vadd.f32 %v986_v25, %v900_v13  ;;  %v594_v27 = vpop.f32.mrb[3].mxu1 }
 0x1d3   : > { %650 = vmax.xlane.f32.xlu0 %v600_v23  ;;  %v595_v29 = vadd.f32 %v900_v13, %v594_v27 }
 0x1d4   : > { %652 = vmax.xlane.f32.xlu1 %v603_v26 }
 0x1d7   : > { %v989_v30 = vpop.f32.mrb[4].mxu1  ;;  %646 = vmax.xlane.f32.xlu0 %v592_v28 }
 0x1d8   : > { %v616_v31 = vadd.f32 %v989_v30, %v900_v13  ;;  %v607_v32 = vpop.f32.mrb[5].mxu1  ;;  %648 = vmax.xlane.f32.xlu1 %v595_v29 }
 0x1d9   : > { %v990_v33 = vpop.f32.mrb[6].mxu1  ;;  %v608_v36 = vadd.f32 %v900_v13, %v607_v32 }
 0x1da   : > { %v619_v34 = vadd.f32 %v990_v33, %v900_v13  ;;  %v610_v35 = vpop.f32.mrb[7].mxu1 }
 0x1db   : > { %658 = vmax.xlane.f32.xlu0 %v616_v31  ;;  %v1215_v37 = vadd.f32 %v900_v13, %v610_v35 }
 0x1dc   : > { %660 = vmax.xlane.f32.xlu1 %v619_v34 }
 0x1df   : > { %v993_v38 = vpop.f32.mrb[8].mxu1  ;;  %654 = vmax.xlane.f32.xlu0 %v608_v36 }
 0x1e0   : > { %v623_v39 = vpop.f32.mrb[9].mxu1  ;;  %656 = vmax.xlane.f32.xlu1 %v1215_v37  ;;  %v1223_v44 = vadd.f32 %v993_v38, %v900_v13 }
 0x1e1   : > { %v1218_v40 = vadd.f32 %v900_v13, %v623_v39  ;;  %v994_v41 = vpop.f32.mrb[10].mxu1 }
 0x1e2   : > { %v626_v42 = vpop.f32.mrb[11].mxu1  ;;  %v1226_v45 = vadd.f32 %v994_v41, %v900_v13 }
 0x1e3   : > { %v1220_v43 = vadd.f32 %v900_v13, %v626_v42  ;;  %662 = vmax.xlane.f32.xlu0 %v1218_v40 }
 0x1e5   : > { %664 = vmax.xlane.f32.xlu1 %v1220_v43 }
 0x1e7   : > { %666 = vmax.xlane.f32.xlu0 %v1223_v44 }
 0x1e9   : > { %668 = vmax.xlane.f32.xlu1 %v1226_v45 }
 0x257   : > { %v643_v46 = vpop.xlane.xlu1 %642 }
 0x258   : > { %v1230_v47 = vsub.f32 %v584_v15, %v643_v46  ;;  %v639_v48 = vpop.xlane.xlu0 %638 }
 0x259   : > { %v1232_v49 = vsub.f32 %v576_v17, %v639_v48 }
 0x25a   : > { %v690_v50 = vmul.f32 1.442695, %v1230_v47 }
 0x25b   : > { %v686_v51 = vmul.f32 1.442695, %v1232_v49  ;;  %v645_v52 = vpop.xlane.xlu1 %644 }
 0x25c   : > { %1039 = vpow2.f32 %v690_v50  ;;  %v1236_v53 = vsub.f32 %v587_v20, %v645_v52  ;;  %v641_v54 = vpop.xlane.xlu0 %640 }
 0x25d   : > { %v1238_v55 = vsub.f32 %v579_v21, %v641_v54  ;;  %1041 = vpow2.f32 %v686_v51 }
 0x25e   : > { %v692_v56 = vmul.f32 1.442695, %v1236_v53 }
 0x25f   : > { %v688_v57 = vmul.f32 1.442695, %v1238_v55 }
 0x260   : > { %1043 = vpow2.f32 %v692_v56  ;;  %v651_v58 = vpop.xlane.xlu0 %650 }
 0x261   : > { %v1242_v59 = vsub.f32 %v600_v23, %v651_v58  ;;  %v653_v60 = vpop.xlane.xlu1 %652  ;;  %1045 = vpow2.f32 %v688_v57 }
 0x262   : > { %v1244_v61 = vsub.f32 %v603_v26, %v653_v60 }
 0x263   : > { %v698_v62 = vmul.f32 1.442695, %v1242_v59 }
 0x264   : > { %v700_v63 = vmul.f32 1.442695, %v1244_v61  ;;  %v647_v0 = vpop.xlane.xlu0 %646 }
 0x265   : > { %1047 = vpow2.f32 %v698_v62  ;;  %v1248_v1 = vsub.f32 %v592_v28, %v647_v0  ;;  %v649_v2 = vpop.xlane.xlu1 %648 }
 0x266   : > { %v1040_v3 = vpop.eup %1039  ;;  %v1250_v4 = vsub.f32 %v595_v29, %v649_v2  ;;  %1049 = vpow2.f32 %v700_v63 }
 0x267   : > { %v694_v5 = vmul.f32 1.442695, %v1248_v1  ;;  %722 = vadd.xlane.f32.xlu0 %v1040_v3  ;;  %v1042_v8 = vpop.eup %1041 }
 0x268   : > { %v696_v6 = vmul.f32 1.442695, %v1250_v4  ;;  %v659_v7 = vpop.xlane.xlu0 %658 }
 0x269   : > { %1051 = vpow2.f32 %v694_v5  ;;  %v1254_v9 = vsub.f32 %v616_v31, %v659_v7  ;;  %v661_v10 = vpop.xlane.xlu1 %660 }
 0x26a   : > { %v1044_v11 = vpop.eup %1043  ;;  %v1256_v12 = vsub.f32 %v619_v34, %v661_v10  ;;  %1053 = vpow2.f32 %v696_v6 }
 0x26b   : > { %v706_v13 = vmul.f32 1.442695, %v1254_v9  ;;  %724 = vadd.xlane.f32.xlu1 %v1044_v11  ;;  %718 = vadd.xlane.f32.xlu0 %v1042_v8  ;;  %v1046_v18 = vpop.eup %1045 }
 0x26c   : > { %v708_v14 = vmul.f32 1.442695, %v1256_v12  ;;  %v655_v15 = vpop.xlane.xlu0 %654 }
 0x26d   : > { %1055 = vpow2.f32 %v706_v13  ;;  %v1260_v16 = vsub.f32 %v608_v36, %v655_v15  ;;  %v657_v17 = vpop.xlane.xlu1 %656 }
 0x26e   : > { %v1263_v19 = vsub.f32 %v1215_v37, %v657_v17  ;;  %1057 = vpow2.f32 %v708_v14 }
 0x26f   : > { %v1048_v20 = vpop.eup %1047  ;;  %v702_v21 = vmul.f32 1.442695, %v1260_v16  ;;  %720 = vadd.xlane.f32.xlu1 %v1046_v18 }
 0x270   : > { %v704_v22 = vmul.f32 1.442695, %v1263_v19  ;;  %730 = vadd.xlane.f32.xlu0 %v1048_v20  ;;  %v663_v23 = vpop.xlane.xlu0 %662  ;;  %v1050_v25 = vpop.eup %1049 }
 0x271   : > { %1059 = vpow2.f32 %v702_v21  ;;  %v1268_v24 = vsub.f32 %v1218_v40, %v663_v23 }
 0x272   : > { %v665_v26 = vpop.xlane.xlu1 %664  ;;  %1061 = vpow2.f32 %v704_v22 }
 0x273   : > { %v1052_v27 = vpop.eup %1051  ;;  %v710_v28 = vmul.f32 1.442695, %v1268_v24  ;;  %v1272_v29 = vsub.f32 %v1220_v43, %v665_v26  ;;  %732 = vadd.xlane.f32.xlu1 %v1050_v25 }
 0x274   : > { %726 = vadd.xlane.f32.xlu0 %v1052_v27  ;;  %v667_v30 = vpop.xlane.xlu0 %666  ;;  %v1054_v33 = vpop.eup %1053 }
 0x275   : > { %1063 = vpow2.f32 %v710_v28  ;;  %v712_v31 = vmul.f32 1.442695, %v1272_v29  ;;  %v1276_v32 = vsub.f32 %v1223_v44, %v667_v30 }
 0x276   : > { %v669_v34 = vpop.xlane.xlu1 %668 }
 0x277   : > { %v1056_v35 = vpop.eup %1055  ;;  %1065 = vpow2.f32 %v712_v31  ;;  %v714_v36 = vmul.f32 1.442695, %v1276_v32  ;;  %v1280_v37 = vsub.f32 %v1226_v45, %v669_v34  ;;  %728 = vadd.xlane.f32.xlu1 %v1054_v33 }
 0x278   : > { %738 = vadd.xlane.f32.xlu0 %v1056_v35  ;;  %v1058_v39 = vpop.eup %1057 }
 0x279   : > { %1067 = vpow2.f32 %v714_v36  ;;  %v716_v38 = vmul.f32 1.442695, %v1280_v37 }
 0x27b   : > { %v1060_v40 = vpop.eup %1059  ;;  %1069 = vpow2.f32 %v716_v38  ;;  %740 = vadd.xlane.f32.xlu1 %v1058_v39 }
 0x27c   : > { %734 = vadd.xlane.f32.xlu0 %v1060_v40  ;;  %v1062_v41 = vpop.eup %1061 }
 0x27f   : > { %v1064_v42 = vpop.eup %1063  ;;  %736 = vadd.xlane.f32.xlu1 %v1062_v41 }
 0x280   : > { %742 = vadd.xlane.f32.xlu0 %v1064_v42 }
 0x281   : > { %v1066_v43 = vpop.eup %1065 }
 0x283   : > { %v1068_v44 = vpop.eup %1067  ;;  %744 = vadd.xlane.f32.xlu1 %v1066_v43 }
 0x284   : > { %746 = vadd.xlane.f32.xlu0 %v1068_v44 }
 0x285   : > { %v1070_v45 = vpop.eup %1069 }
 0x287   : > { %748 = vadd.xlane.f32.xlu1 %v1070_v45 }
 0x2f4   : > { %v723_v46 = vpop.xlane.xlu0 %722 }
 0x2f5   : > { %1071 = vlog2.f32 %v723_v46 }
 0x2f8   : > { %v725_v48 = vpop.xlane.xlu1 %724  ;;  %v719_v50 = vpop.xlane.xlu0 %718 }
 0x2f9   : > { %1073 = vlog2.f32 %v725_v48 }
 0x2fa   : > { %1075 = vlog2.f32 %v719_v50 }
 0x2fc   : > { %v721_v51 = vpop.xlane.xlu1 %720 }
 0x2fd   : > { %1077 = vlog2.f32 %v721_v51  ;;  %v731_v52 = vpop.xlane.xlu0 %730 }
 0x2fe   : > { %1079 = vlog2.f32 %v731_v52 }
 0x2ff   : > { %v1072_v54 = vpop.eup %1071 }
 0x300   : > { %v755_v56 = vmul.f32 0.6931472, %v1072_v54  ;;  %v733_v57 = vpop.xlane.xlu1 %732 }
 0x301   : > { %1081 = vlog2.f32 %v733_v57  ;;  %v727_v58 = vpop.xlane.xlu0 %726 }
 0x302   : > { %v784_v60 = vsub.f32 %v1230_v47, %v755_v56  ;;  %1083 = vlog2.f32 %v727_v58 }
 0x303   : > { %v1074_v62 = vpop.eup %1073 }
 0x304   : > { %v1076_v63 = vpop.eup %1075  ;;  %800 = vst [vmem:[%s1287_s8 + $0x10] sm:$0xff] %v784_v60  ;;  %v757_v0 = vmul.f32 0.6931472, %v1074_v62  ;;  %v729_v2 = vpop.xlane.xlu1 %728 }
 0x305   : > { %v751_v3 = vmul.f32 0.6931472, %v1076_v63  ;;  %1085 = vlog2.f32 %v729_v2  ;;  %v739_v5 = vpop.xlane.xlu0 %738 }
 0x306   : > { %v785_v6 = vsub.f32 %v1236_v53, %v757_v0  ;;  %1087 = vlog2.f32 %v739_v5 }
 0x307   : > { %v1078_v7 = vpop.eup %1077  ;;  %v782_v8 = vsub.f32 %v1232_v49, %v751_v3 }
 0x308   : > { %v1080_v10 = vpop.eup %1079  ;;  %801 = vst [vmem:[%s1287_s8 + $0x18] sm:$0xff] %v785_v6  ;;  %v753_v47 = vmul.f32 0.6931472, %v1078_v7  ;;  %v741_v11 = vpop.xlane.xlu1 %740 }
 0x309   : > { %798 = vst [vmem:[%s1287_s8] sm:$0xff] %v782_v8  ;;  %v763_v13 = vmul.f32 0.6931472, %v1080_v10  ;;  %1089 = vlog2.f32 %v741_v11  ;;  %v735_v14 = vpop.xlane.xlu0 %734 }
 0x30a   : > { %v783_v15 = vsub.f32 %v1238_v55, %v753_v47  ;;  %1091 = vlog2.f32 %v735_v14 }
 0x30b   : > { %v1082_v17 = vpop.eup %1081  ;;  %v788_v53 = vsub.f32 %v1242_v59, %v763_v13 }
 0x30c   : > { %v1084_v18 = vpop.eup %1083  ;;  %799 = vst [vmem:[%s1287_s8 + $0x8] sm:$0xff] %v783_v15  ;;  %v765_v49 = vmul.f32 0.6931472, %v1082_v17  ;;  %v737_v20 = vpop.xlane.xlu1 %736 }
 0x30d   : > { %804 = vst [vmem:[%s1287_s8 + $0x30] sm:$0xff] %v788_v53  ;;  %v759_v21 = vmul.f32 0.6931472, %v1084_v18  ;;  %1093 = vlog2.f32 %v737_v20  ;;  %v743_v22 = vpop.xlane.xlu0 %742 }
 0x30e   : > { %v789_v23 = vsub.f32 %v1244_v61, %v765_v49  ;;  %1095 = vlog2.f32 %v743_v22 }
 0x30f   : > { %v1086_v25 = vpop.eup %1085  ;;  %v786_v55 = vsub.f32 %v1248_v1, %v759_v21 }
 0x310   : > { %v1088_v26 = vpop.eup %1087  ;;  %805 = vst [vmem:[%s1287_s8 + $0x38] sm:$0xff] %v789_v23  ;;  %v761_v59 = vmul.f32 0.6931472, %v1086_v25  ;;  %v745_v27 = vpop.xlane.xlu1 %744 }
 0x311   : > { %802 = vst [vmem:[%s1287_s8 + $0x20] sm:$0xff] %v786_v55  ;;  %v771_v28 = vmul.f32 0.6931472, %v1088_v26  ;;  %1097 = vlog2.f32 %v745_v27  ;;  %v747_v30 = vpop.xlane.xlu0 %746 }
 0x312   : > { %v787_v31 = vsub.f32 %v1250_v4, %v761_v59  ;;  %1099 = vlog2.f32 %v747_v30 }
 0x313   : > { %v1090_v61 = vpop.eup %1089  ;;  %v792_v33 = vsub.f32 %v1254_v9, %v771_v28 }
 0x314   : > { %v1092_v34 = vpop.eup %1091  ;;  %803 = vst [vmem:[%s1287_s8 + $0x28] sm:$0xff] %v787_v31  ;;  %v773_v1 = vmul.f32 0.6931472, %v1090_v61  ;;  %v749_v35 = vpop.xlane.xlu1 %748 }
 0x315   : > { %808 = vst [vmem:[%s1287_s8 + $0x50] sm:$0xff] %v792_v33  ;;  %v767_v36 = vmul.f32 0.6931472, %v1092_v34  ;;  %1101 = vlog2.f32 %v749_v35 }
 0x316   : > { %v793_v38 = vsub.f32 %v1256_v12, %v773_v1 }
 0x317   : > { %v1094_v39 = vpop.eup %1093  ;;  %v790_v40 = vsub.f32 %v1260_v16, %v767_v36 }
 0x318   : > { %v1096_v4 = vpop.eup %1095  ;;  %809 = vst [vmem:[%s1287_s8 + $0x58] sm:$0xff] %v793_v38  ;;  %v769_v41 = vmul.f32 0.6931472, %v1094_v39 }
 0x319   : > { %806 = vst [vmem:[%s1287_s8 + $0x40] sm:$0xff] %v790_v40  ;;  %v775_v9 = vmul.f32 0.6931472, %v1096_v4 }
 0x31a   : > { %v791_v42 = vsub.f32 %v1263_v19, %v769_v41 }
 0x31b   : > { %v1098_v43 = vpop.eup %1097  ;;  %v794_v44 = vsub.f32 %v1268_v24, %v775_v9 }
 0x31c   : > { %v1100_v45 = vpop.eup %1099  ;;  %807 = vst [vmem:[%s1287_s8 + $0x48] sm:$0xff] %v791_v42  ;;  %v777_v46 = vmul.f32 0.6931472, %v1098_v43 }
 0x31d   : > { %810 = vst [vmem:[%s1287_s8 + $0x60] sm:$0xff] %v794_v44  ;;  %v779_v12 = vmul.f32 0.6931472, %v1100_v45 }
 0x31e   : > { %v795_v16 = vsub.f32 %v1272_v29, %v777_v46 }
 0x31f   : > { %v1102_v48 = vpop.eup %1101  ;;  %v796_v50 = vsub.f32 %v1276_v32, %v779_v12 }
 0x320   : > { %811 = vst [vmem:[%s1287_s8 + $0x68] sm:$0xff] %v795_v16  ;;  %v781_v51 = vmul.f32 0.6931472, %v1102_v48 }
 0x321   : > { %812 = vst [vmem:[%s1287_s8 + $0x70] sm:$0xff] %v796_v50 }
 0x322   : > { %v797_v52 = vsub.f32 %v1280_v37, %v781_v51 }
 0x324   : > { %813 = vst [vmem:[%s1287_s8 + $0x78] sm:$0xff] %v797_v52 }
 0x325 PF: > { %s15_s18 = sadd.s32 1, %s1109_s18  }
 0x326   : > { %p12_p4 = scmp.ge.s32.totalorder %s15_s18, 4  }
 0x328   :  { %14 = sbr.rel (!%p12_p4) target bundleno = 1 (0x1), region = 70 }

</bundles_post_ra>
